<compile_context>
chip_gen: v7x
topology: tpu7x:2x2x1
jax: 0.10.0
libtpu: 0.0.40
codegen_flags: <defaults>
</compile_context>

<pallas_src>
import functools

import jax
import jax.numpy as jnp
from jax.experimental import pallas as pl
from jax.experimental.pallas import tpu as pltpu


# ----------------------------- per-generation tuning -----------------------------------

def _select_tuning():
    """Scoped-VMEM limit and default row tile, keyed on physical VMEM capacity."""
    vmem_cap = 64 * 1024 * 1024                      # conservative default (v7x per-TC)
    try:
        vmem_cap = int(pltpu.get_tpu_info().vmem_capacity_bytes)
    except Exception:
        pass
    if vmem_cap >= 128 * 1024 * 1024:                # v5e / v6e: 128 MiB physical VMEM
        return 100 * 1024 * 1024, 512
    return 56 * 1024 * 1024, 256                     # v7x: 64 MiB per TC


def _resident(block_shape):
    """Constant-index_map operand: fetched once, VMEM-resident, single-buffered."""
    index_map = lambda i: (0,) * len(block_shape)
    try:
        return pl.BlockSpec(block_shape, index_map, pipeline_mode=pl.Buffered(1))
    except Exception:                                # fallback: default double-buffering
        return pl.BlockSpec(block_shape, index_map)


# ----------------------------- layer 0: x1 = x @ W1 (+ attention scores) ---------------

def _proj_kernel(x_ref, w_ref, att_ref, x1_ref, s_ref):
    x1 = jnp.dot(x_ref[...], w_ref[...], preferred_element_type=jnp.float32)
    # fused skinny attention projections, computed ONCE here (hoisted out of gat_layer)
    s_ref[...] = jnp.dot(x1, att_ref[...], preferred_element_type=jnp.float32)
    x1_ref[...] = x1.astype(jnp.bfloat16)            # bf16 residency for the GAT layer


def gat_project(x, w1, att, *, tm, compiler_params):
    n, c_in = x.shape
    f_out = w1.shape[1]
    return pl.pallas_call(
        _proj_kernel,
        out_shape=(jax.ShapeDtypeStruct((n, f_out), jnp.bfloat16),
                   jax.ShapeDtypeStruct((n, 2), jnp.float32)),
        grid_spec=pltpu.PrefetchScalarGridSpec(
            num_scalar_prefetch=0,
            grid=(pl.cdiv(n, tm),),
            in_specs=[pl.BlockSpec((tm, c_in), lambda i: (i, 0)),   # x rows (streamed)
                      _resident((c_in, f_out)),                      # W1
                      _resident((f_out, 2))],                        # [att_dst | att_src]
            out_specs=(pl.BlockSpec((tm, f_out), lambda i: (i, 0)),
                       pl.BlockSpec((tm, 2), lambda i: (i, 0)))),
        compiler_params=compiler_params,
        cost_estimate=pl.CostEstimate(
            flops=2 * n * c_in * f_out + 4 * n * f_out,
            transcendentals=0,
            bytes_accessed=4 * (n * c_in + c_in * f_out) + 2 * n * f_out + 4 * n * 2),
    )(x, w1, att)


# ----------------------------- GAT attention + aggregation ----------------------------

def _gat_kernel(a_ref, x1f_ref, src_ref, dst_ref, b1_ref, o_ref, *, tm):
    r0 = pl.multiple_of(pl.program_id(0) * tm, tm)

    a_t = a_ref[...]                                  # (TM, N) int8, self loops baked in
    dst = dst_ref[pl.ds(r0, tm), :]                   # (TM, 1) resident slice, no extra DMA
    src = src_ref[...]                                # (1, N)  precomputed, pre-transposed

    # e[i, j] = LeakyReLU(dst_i + src_j), masked to edges (diag already set in a_t)
    e = dst + src                                     # (TM, N) f32
    e = jnp.where(e >= 0.0, e, 0.2 * e)
    e = jnp.where(a_t > 0, e, -1e30)

    # softmax over incoming edges; masked entries underflow to exactly 0 after exp
    e = e - jnp.max(e, axis=1, keepdims=True)
    p = jnp.exp(e)                                    # (TM, N) f32
    denom = jnp.sum(p, axis=1, keepdims=True)         # (TM, 1)

    # alpha never materialized: fold 1/denom in as a row scale of the aggregation output
    h = jnp.dot(p.astype(jnp.bfloat16), x1f_ref[...],
                preferred_element_type=jnp.float32)   # (TM, 256) bf16 x bf16, f32 acc
    h = h * pl.reciprocal(denom) + b1_ref[...]        # exact reciprocal (correctness)
    o_ref[...] = jnp.maximum(h, 0.0).astype(o_ref.dtype)   # fused ReLU, bf16 residency out


def gat_layer(a_gat_i8, x1_bf16, src_row, dst_col, b1, *, tm, compiler_params):
    n, f = x1_bf16.shape
    kernel = functools.partial(_gat_kernel, tm=tm)
    return pl.pallas_call(
        kernel,
        out_shape=jax.ShapeDtypeStruct((n, f), jnp.bfloat16),
        grid_spec=pltpu.PrefetchScalarGridSpec(
            num_scalar_prefetch=0,
            grid=(pl.cdiv(n, tm),),
            in_specs=[
                pl.BlockSpec((tm, n), lambda i: (i, 0)),   # int8 adjacency rows (streamed)
                _resident((n, f)),                          # x1 bf16 (resident, fetched once)
                _resident((1, n)),                          # src attention scores (row)
                _resident((n, 1)),                          # dst attention scores (column)
                _resident((1, f)),                          # bias
            ],
            out_specs=pl.BlockSpec((tm, f), lambda i: (i, 0))),
        compiler_params=compiler_params,
        cost_estimate=pl.CostEstimate(
            flops=2 * n * n * f + 6 * n * n,
            transcendentals=n * n,
            bytes_accessed=n * n + 4 * n * f + 8 * n + 4 * f),
    )(a_gat_i8, x1_bf16, src_row, dst_col, b1)


# ----------------------------- SAGE layer ----------------------------------------------

def _sage_kernel(a_ref, hf_ref, invdeg_ref, wl_ref, wr_ref, b_ref, o_ref, *, tm, apply_relu):
    r0 = pl.multiple_of(pl.program_id(0) * tm, tm)

    # int8 -> bf16 upcast of the streamed tile only (portable: v7x MXU has no int path)
    a_bf = a_ref[...].astype(jnp.bfloat16)             # (TM, N)
    agg = jnp.dot(a_bf, hf_ref[...],
                  preferred_element_type=jnp.float32)   # (TM, Fin) bf16 x bf16, f32 acc
    agg = agg * invdeg_ref[pl.ds(r0, tm), :]            # mean via precomputed 1/deg

    # root path: slice resident bf16 features, cast only the (TM, Fin) slice to f32
    root = hf_ref[pl.ds(r0, tm), :].astype(jnp.float32)

    # two dots summed (no concat buffer): W_l . mean_agg + b_l + W_r . root
    out = (jnp.dot(agg, wl_ref[...], preferred_element_type=jnp.float32)
           + jnp.dot(root, wr_ref[...], preferred_element_type=jnp.float32)
           + b_ref[...])
    if apply_relu:
        out = jnp.maximum(out, 0.0)
    o_ref[...] = out.astype(o_ref.dtype)


def sage_layer(a_i8, h_bf16, inv_deg, wl, wr, b, *, apply_relu, out_dtype, tm,
               compiler_params):
    n, f_in = h_bf16.shape
    f_out = wl.shape[1]
    kernel = functools.partial(_sage_kernel, tm=tm, apply_relu=apply_relu)
    return pl.pallas_call(
        kernel,
        out_shape=jax.ShapeDtypeStruct((n, f_out), out_dtype),
        grid_spec=pltpu.PrefetchScalarGridSpec(
            num_scalar_prefetch=0,
            grid=(pl.cdiv(n, tm),),
            in_specs=[
                pl.BlockSpec((tm, n), lambda i: (i, 0)),   # int8 adjacency rows (streamed)
                _resident((n, f_in)),                       # h bf16 (resident, fetched once)
                _resident((n, 1)),                          # 1 / max(deg, 1)
                _resident((f_in, f_out)),                   # W_l
                _resident((f_in, f_out)),                   # W_r
                _resident((1, f_out)),                      # b_l
            ],
            out_specs=pl.BlockSpec((tm, f_out), lambda i: (i, 0))),
        compiler_params=compiler_params,
        cost_estimate=pl.CostEstimate(
            flops=2 * n * n * f_in + 4 * n * f_in * f_out,
            transcendentals=0,
            bytes_accessed=n * n + 2 * n * f_in + 8 * f_in * f_out
                           + n * f_out * jnp.dtype(out_dtype).itemsize + 4 * n),
    )(a_i8, h_bf16, inv_deg, wl, wr, b)


# ----------------------------- full NodeEncoder forward --------------------------------

def node_encoder(x, a, params, encode_size=128, tm=None):
    """x: (N, C_in) f32;  a: (N, N) dense mask, a[i, j]=1 iff edge j -> i (NO self loops)."""
    n = x.shape[0]
    assert params["wl3"].shape[1] == encode_size

    vmem_limit, tm_auto = _select_tuning()
    if tm is None:
        tm = min(n, tm_auto)
    # TODO(synk): pad ragged N (zero adjacency columns, discard padded-row outputs).
    assert n % tm == 0 and tm % 32 == 0   # 32: int8 sublane packing (covers bf16/f32 too)

    cp = pltpu.CompilerParams(
        dimension_semantics=("parallel",),            # row-tile grid shards across TCs
        vmem_limit_bytes=vmem_limit)

    # ---- glue, done ONCE outside the kernels ----
    a_i8 = a.astype(jnp.int8)                                     # SAGE adjacency (1 B/elem)
    a_gat_i8 = jnp.maximum(a_i8, jnp.eye(n, dtype=jnp.int8))      # GAT: self loops baked in
    deg = jnp.sum(a.astype(jnp.float32), axis=1, keepdims=True)   # (N, 1)
    inv_deg = 1.0 / jnp.maximum(deg, 1.0)                         # exact, shared by both SAGEs
    att = jnp.concatenate([params["att_dst"], params["att_src"]], axis=1)   # (256, 2)

    # layer 0: projection + hoisted attention scores
    x1_bf16, scores = gat_project(x, params["w1"], att, tm=tm, compiler_params=cp)
    src_row = jnp.transpose(scores[:, 1:2])                       # (1, N), transposed once
    dst_col = scores[:, 0:1]                                      # (N, 1)

    h1 = gat_layer(a_gat_i8, x1_bf16, src_row, dst_col, params["b1"],
                   tm=tm, compiler_params=cp)                                     # bf16, ReLU fused
    h2 = sage_layer(a_i8, h1, inv_deg, params["wl2"], params["wr2"], params["bl2"],
                    apply_relu=True, out_dtype=jnp.bfloat16, tm=tm, compiler_params=cp)
    out = sage_layer(a_i8, h2, inv_deg, params["wl3"], params["wr3"], params["bl3"],
                     apply_relu=False, out_dtype=jnp.float32, tm=tm, compiler_params=cp)
    return out


def make_params(key, in_channel, encode_size):
    ks = jax.random.split(key, 10)
    g = lambda k, shape, fan_in: (jax.random.normal(k, shape, jnp.float32)
                                  / jnp.sqrt(jnp.float32(fan_in)))
    return {
        # GATConv(in_channel, 256), heads=1
        "w1":      g(ks[0], (in_channel, 256), in_channel),
        "att_src": g(ks[1], (256, 1), 256),
        "att_dst": g(ks[2], (256, 1), 256),
        "b1":      jnp.zeros((1, 256), jnp.float32),
        # SAGEConv(256, 128): lin_l (bias) on mean-aggregated neighbors, lin_r on root
        "wl2":     g(ks[3], (256, 128), 256),
        "bl2":     jnp.zeros((1, 128), jnp.float32),
        "wr2":     g(ks[4], (256, 128), 256),
        # SAGEConv(128, encode_size)
        "wl3":     g(ks[5], (128, encode_size), 128),
        "bl3":     jnp.zeros((1, encode_size), jnp.float32),
        "wr3":     g(ks[6], (128, encode_size), 128),
    }


if __name__ == "__main__":
    key = jax.random.PRNGKey(0)
    k_x, k_e1, k_e2, k_p = jax.random.split(key, 4)

    N = 64            # number of graph nodes
    C_IN = 4          # in_channel
    ENC = 128         # encode_size (module default)
    E = 256           # number of directed edges
    TM = 32           # row tile -> 2 grid steps here (use 256-512 for large graphs)

    # node features
    x = jax.random.normal(k_x, (N, C_IN), jnp.float32)

    # edge_index: row 0 = source, row 1 = target (PyG convention)
    src = jax.random.randint(k_e1, (E,), 0, N)
    tgt = jax.random.randint(k_e2, (E,), 0, N)

    # dense adjacency mask A[i, j] = 1 iff edge j -> i (glue built outside the kernels)
    a = jnp.zeros((N, N), jnp.float32).at[tgt, src].set(1.0)

    params = make_params(k_p, C_IN, ENC)

    out = node_encoder(x, a, params, encode_size=ENC, tm=TM)
    out = jax.block_until_ready(out)
    assert out.shape == (N, ENC) and out.dtype == jnp.float32
    assert bool(jnp.all(jnp.isfinite(out)))
    print("KERNEL_OK")
</pallas_src>

<mosaic_0001>
module attributes {stable_mosaic.version = 11 : i64} {
  func.func @_proj_kernel(%arg0: i32, %arg1: memref<32x4xf32, #tpu.memory_space<vmem>>, %arg2: memref<4x256xf32, #tpu.memory_space<vmem>>, %arg3: memref<256x2xf32, #tpu.memory_space<vmem>>, %arg4: memref<32x256xbf16, #tpu.memory_space<vmem>>, %arg5: memref<32x2xf32, #tpu.memory_space<vmem>>) attributes {dimension_semantics = [#tpu.dimension_semantics<parallel>], iteration_bounds = array<i64: 2>, scalar_prefetch = 0 : i64, scratch_operands = 0 : i64, tpu.core_type = #tpu.core_type<tc>, window_params = [{transform_indices = @transform_0, window_bounds = array<i64: 32, 4>}, {pipeline_mode = #tpu.pipeline_mode<synchronous>, transform_indices = @transform_1, window_bounds = array<i64: 4, 256>}, {pipeline_mode = #tpu.pipeline_mode<synchronous>, transform_indices = @transform_2, window_bounds = array<i64: 256, 2>}, {transform_indices = @transform_3, window_bounds = array<i64: 32, 256>}, {transform_indices = @transform_4, window_bounds = array<i64: 32, 2>}]} {
    %c0 = arith.constant 0 : index
    %c0_0 = arith.constant 0 : index
    %0 = vector.load %arg1[%c0, %c0_0] : memref<32x4xf32, #tpu.memory_space<vmem>>, vector<32x4xf32>
    %c0_1 = arith.constant 0 : index
    %c0_2 = arith.constant 0 : index
    %1 = vector.load %arg2[%c0_1, %c0_2] : memref<4x256xf32, #tpu.memory_space<vmem>>, vector<4x256xf32>
    %cst = arith.constant dense<0.000000e+00> : vector<32x256xf32>
    %2 = tpu.matmul %0, %1, %cst {dimension_numbers = #tpu.dot_dimension_numbers<[1], [0], [0], [1], [0, 0, 1, 1], [], []>} : vector<32x4xf32>, vector<4x256xf32>, vector<32x256xf32> -> vector<32x256xf32>
    %c0_3 = arith.constant 0 : index
    %c0_4 = arith.constant 0 : index
    %3 = vector.load %arg3[%c0_3, %c0_4] : memref<256x2xf32, #tpu.memory_space<vmem>>, vector<256x2xf32>
    %cst_5 = arith.constant dense<0.000000e+00> : vector<32x2xf32>
    %4 = tpu.matmul %2, %3, %cst_5 {dimension_numbers = #tpu.dot_dimension_numbers<[1], [0], [0], [1], [0, 0, 1, 1], [], []>} : vector<32x256xf32>, vector<256x2xf32>, vector<32x2xf32> -> vector<32x2xf32>
    %c0_6 = arith.constant 0 : index
    %c0_7 = arith.constant 0 : index
    %5 = vector.load %arg5[%c0_6, %c0_7] : memref<32x2xf32, #tpu.memory_space<vmem>>, vector<32x2xf32>
    tpu.vector_store %arg5[%c0_6, %c0_7], %4 {strides = array<i32>} : memref<32x2xf32, #tpu.memory_space<vmem>>, vector<32x2xf32>,
    %6 = arith.truncf %2 : vector<32x256xf32> to vector<32x256xbf16>
    %c0_8 = arith.constant 0 : index
    %c0_9 = arith.constant 0 : index
    %7 = vector.load %arg4[%c0_8, %c0_9] : memref<32x256xbf16, #tpu.memory_space<vmem>>, vector<32x256xbf16>
    tpu.vector_store %arg4[%c0_8, %c0_9], %6 {strides = array<i32>} : memref<32x256xbf16, #tpu.memory_space<vmem>>, vector<32x256xbf16>,
    return
  }
  func.func @transform_0(%arg0: i32) -> (i32, i32) {
    %c0_i32 = arith.constant 0 : i32
    %c0_i32_0 = arith.constant 0 : i32
    return %arg0, %c0_i32 : i32, i32
  }
  func.func @transform_1(%arg0: i32) -> (i32, i32) {
    %c0_i32 = arith.constant 0 : i32
    %c0_i32_0 = arith.constant 0 : i32
    %c0_i32_1 = arith.constant 0 : i32
    return %c0_i32, %c0_i32_0 : i32, i32
  }
  func.func @transform_2(%arg0: i32) -> (i32, i32) {
    %c0_i32 = arith.constant 0 : i32
    %c0_i32_0 = arith.constant 0 : i32
    %c0_i32_1 = arith.constant 0 : i32
    return %c0_i32, %c0_i32_0 : i32, i32
  }
  func.func @transform_3(%arg0: i32) -> (i32, i32) {
    %c0_i32 = arith.constant 0 : i32
    %c0_i32_0 = arith.constant 0 : i32
    return %arg0, %c0_i32 : i32, i32
  }
  func.func @transform_4(%arg0: i32) -> (i32, i32) {
    %c0_i32 = arith.constant 0 : i32
    %c0_i32_0 = arith.constant 0 : i32
    return %arg0, %c0_i32 : i32, i32
  }
}

</mosaic_0001>

<bundles_post_ra>
// kernel: tpu_custom_call.1
= control target key start
LH: loop header
LB: loop body
LE: loop exit
PB: predicated region body
PF: predicated region fallthrough
CT: control target
= control target key end

     0   :  { %10 = vsyncpa [#allocation3], 0  ;;  %s1074_s0 = inlined_call_operand.vmem [shape: f32[64,4], index: 0, kind: input, shape index: {}]   ;;  %s1075_s1 = inlined_call_operand.vmem [shape: f32[4,256], index: 1, kind: input, shape index: {}]   ;;  %s1076_s2 = inlined_call_operand.vmem [shape: f32[256,2], index: 2, kind: input, shape index: {}]   ;;  %s1077_s3 = inlined_call_operand.hbm [shape: bf16[64,256], index: 3, kind: output, shape index: {0}]   ;;  %s1078_s4 = inlined_call_operand.vmem [shape: f32[64,2], index: 4, kind: output, shape index: {1}]  }
   0x1   :  { %12 = vsyncpa [#allocation3 + $0x1], 0  ;;  %s847_s15 = smov 0   ;;  %s849_s16 = smov 0  }
   0x2   :  { %s851_s17 = smov 0   ;;  %s853_s18 = smov 0  }
   0x3 LB: > { %s868_s19 = sadd.s32 4294967295, %s816_s18   ;;  %s588_s20 = sadd.s32 4294967294, %s816_s18   ;;  %s816_s18 = sphi %s853_s18, %s1084_s18   ;;  %s812_s17 = sphi %s851_s17, %s1083_s17   ;;  %s808_s16 = sphi %s849_s16, %s1082_s16   ;;  %s804_s15 = sphi %s847_s15, %s1081_s15  }
   0x4   : > { %s872_s21 = sadd.s32 1, %s816_s18   ;;  %s93_s22 = sadd.s32 1, %s812_s17 }
   0x5   : > { %s90_s23 = ssub.s32 %s816_s18, %s872_s21  ;;  %p103_p0 = scmp.ne.s32.totalorder %s812_s17, %s808_s16 }
   0x6   : > { %p91_p1 = scmp.eq.s32.totalorder %s90_s23, 0  ;;  %p104_p2 = scmp.eq.s32.totalorder %s868_s19, 1 }
   0x7   : > { %p109_p3 = scmp.ne.s32.totalorder %s808_s16, %s804_s15  ;;  %p110_p4 = scmp.eq.s32.totalorder %s588_s20, 1 }
   0x8   : > { %s883_s24 = scalar_select %p91_p1, %s812_s17, %s93_s22  }
   0x9   : > { %p885_p5 = por %p104_p2, %p103_p0  ;;  %p889_p6 = por %p110_p4, %p109_p3 }
   0xa   : > { %p591_p7 = scmp.ge.s32.totalorder %s816_s18, 1  ;;  %p169_p8 = scmp.lt.s32.totalorder %s816_s18, 3 }
   0xc   : > { %p170_p9 = pnand %p591_p7, %p169_p8 }
   0xd   : > { %v217_v0 = vld [vmem:[%s1075_s1] sm:$0xff] (!%p170_p9)  ;;  %vm233_vm0 = vcmask (!%p170_p9), 1043456   ;;  %s593_s29 = sshll.u32 (!%p170_p9), %s868_s19, 2  ;;  %v818_v3 = vmov (!%p170_p9), 0.0   ;;  %v344_v4 = vld [vmem:[%s1076_s2 + $0x88] sm:$0xff] (!%p170_p9)  ;;  %v345_v8 = vld [vmem:[%s1076_s2 + $0x90] sm:$0xff] (!%p170_p9) }
   0xe   : > { %173 = sbr.rel (%p170_p9) target bundleno = 467 (0x1d3), region = 32  ;;  %v343_v1 = vld [vmem:[%s1076_s2 + $0x80] sm:$0xff] (!%p170_p9)  ;;  %v219_v2 = vcombine.high (!%p170_p9), %v217_v0, %v217_v0  ;;  %302 = vmatprep.mubr.f32.mxu0 (!%p170_p9), %v818_v3  ;;  %p201_p10 = scmp.lt.s32.totalorder (!%p170_p9), %s593_s29, 7  ;;  %v328_v6 = vld [vmem:[%s1076_s2 + $0x8] sm:$0xff] (!%p170_p9)  ;;  %v346_v9 = vld [vmem:[%s1076_s2 + $0x98] sm:$0xff] (!%p170_p9)  ;;  %vm220_vm1 = vcmask (!%p170_p9), 31744  }
   0xf   : > { %v327_v5 = vld [vmem:[%s1076_s2] sm:$0xff] (!%p170_p9)  ;;  %v663_v7 = vpack.c.bf16 (!%p170_p9), %v344_v4, %v343_v1  ;;  %v667_v11 = vpack.c.bf16 (!%p170_p9), %v346_v9, %v345_v8  ;;  %v329_v12 = vld [vmem:[%s1076_s2 + $0x10] sm:$0xff] (!%p170_p9)  ;;  %v330_v13 = vld [vmem:[%s1076_s2 + $0x18] sm:$0xff] (!%p170_p9)  ;;  %s190_s12 = sand.u32 (!%p170_p9), 1, %s808_s16   ;;  %s618_s23 = sshll.u32 (!%p170_p9), %s868_s19, 9 }
  0x10   : > { %597 = vmatprep.subr.msk.mxu0 (!%p170_p9), %vm233_vm0, %v219_v2  ;;  %v665_v10 = vpack.c.bf16 (!%p170_p9), %v328_v6, %v327_v5  ;;  %v347_v14 = vld [vmem:[%s1076_s2 + $0xa0] sm:$0xff] (!%p170_p9)  ;;  %v348_v15 = vld [vmem:[%s1076_s2 + $0xa8] sm:$0xff] (!%p170_p9)  ;;  %v669_v17 = vpack.c.bf16 (!%p170_p9), %v330_v13, %v329_v12  ;;  %v349_v22 = vld [vmem:[%s1076_s2 + $0xb0] sm:$0xff] (!%p170_p9)  ;;  %s592_s13 = sshll.u32 (!%p170_p9), %s190_s12, 5  ;;  %s1024_s30 = scalar_lea.hbm (!%p170_p9), %s1077_s3, %s618_s23 }
  0x11   : > { %598 = vmatpush1.msk.msra.mxu0 (!%p170_p9), %vm233_vm0, %v217_v0  ;;  %695 = vmatprep.subr.bf16.mxu1 (!%p170_p9), %v663_v7  ;;  %v671_v19 = vpack.c.bf16 (!%p170_p9), %v348_v15, %v347_v14  ;;  %v331_v20 = vld [vmem:[%s1076_s2 + $0x20] sm:$0xff] (!%p170_p9)  ;;  %v332_v21 = vld [vmem:[%s1076_s2 + $0x28] sm:$0xff] (!%p170_p9)  ;;  %v350_v23 = vld [vmem:[%s1076_s2 + $0xb8] sm:$0xff] (!%p170_p9)  ;;  %s192_s14 = scalar_lea.vmem (!%p170_p9), [#allocation2], %s592_s13  ;;  %s1028_s5 = scalar_lea.sflag (!%p170_p9), [#allocation3], %s190_s12 }
  0x12   : > { %664 = vmatprep.subr.bf16.mxu0 (!%p170_p9), %v663_v7  ;;  %703 = vmatpush3.bf16.msra.mxu1 (!%p170_p9), %v665_v10  ;;  %v673_v24 = vpack.c.bf16 (!%p170_p9), %v332_v21, %v331_v20  ;;  %v675_v26 = vpack.c.bf16 (!%p170_p9), %v350_v23, %v349_v22  ;;  %v333_v27 = vld [vmem:[%s1076_s2 + $0x30] sm:$0xff] (!%p170_p9)  ;;  %v334_v28 = vld [vmem:[%s1076_s2 + $0x38] sm:$0xff] (!%p170_p9)  ;;  %v351_v29 = vld [vmem:[%s1076_s2 + $0xc0] sm:$0xff] (!%p170_p9)  ;;  %s497_s20 = sshll.u32 (!%p170_p9), %s192_s14, 4  ;;  %s1018_s20 = int_to_ptr.vmem [resolvable:$true] %s497_s20 }
  0x13   : > { %696 = vmatprep.subr.bf16.mxu1 (!%p170_p9), %v667_v11  ;;  %v352_v30 = vld [vmem:[%s1076_s2 + $0xc8] sm:$0xff] (!%p170_p9)  ;;  %v677_v31 = vpack.c.bf16 (!%p170_p9), %v334_v28, %v333_v27  ;;  %v335_v34 = vld [vmem:[%s1076_s2 + $0x40] sm:$0xff] (!%p170_p9)  ;;  %v353_v36 = vld [vmem:[%s1076_s2 + $0xd0] sm:$0xff] (!%p170_p9)  ;;  %s754_s6 = scalar_lea.vmem (!%p170_p9), %s1018_s20, 512 }
  0x14   : > { %v679_v33 = vpack.c.bf16 (!%p170_p9), %v352_v30, %v351_v29  ;;  %v336_v35 = vld [vmem:[%s1076_s2 + $0x48] sm:$0xff] (!%p170_p9)  ;;  %v354_v37 = vld [vmem:[%s1076_s2 + $0xd8] sm:$0xff] (!%p170_p9)  ;;  %v337_v40 = vld [vmem:[%s1076_s2 + $0x50] sm:$0xff] (!%p170_p9)  ;;  %p755_p11 = scmp.ne.s32.totalorder (!%p170_p9), %s1018_s20, %s754_s6 }
  0x15   : > { %s1086_s29 = smov (!%p201_p10, %s593_s29), 7  ;;  %v681_v38 = vpack.c.bf16 %v336_v35, %v335_v34  ;;  %v683_v39 = vpack.c.bf16 %v354_v37, %v353_v36  ;;  %v338_v41 = vld [vmem:[%s1076_s2 + $0x58] sm:$0xff]  ;;  %v355_v42 = vld [vmem:[%s1076_s2 + $0xe0] sm:$0xff]  ;;  %v356_v43 = vld [vmem:[%s1076_s2 + $0xe8] sm:$0xff] }
  0x16   : > { %s594_s22 = sshll.u32 %s1086_s29, 3  ;;  %704 = vmatpush3.bf16.msra.mxu1 %v669_v17  ;;  %v685_v44 = vpack.c.bf16 %v338_v41, %v337_v40  ;;  %v687_v45 = vpack.c.bf16 %v356_v43, %v355_v42  ;;  %v339_v46 = vld [vmem:[%s1076_s2 + $0x60] sm:$0xff]  ;;  %v340_v47 = vld [vmem:[%s1076_s2 + $0x68] sm:$0xff]  ;;  %v357_v48 = vld [vmem:[%s1076_s2 + $0xf0] sm:$0xff]  ;;  %p756_p12 = pnand %p755_p11, %p885_p5 }
  0x17   : > { %s933_s7 = scalar_lea.vmem %s1074_s0, %s594_s22  ;;  %697 = vmatprep.subr.bf16.mxu1 %v671_v19  ;;  %v358_v49 = vld [vmem:[%s1076_s2 + $0xf8] sm:$0xff]  ;;  %v689_v50 = vpack.c.bf16 %v340_v47, %v339_v46  ;;  %v341_v52 = vld [vmem:[%s1076_s2 + $0x70] sm:$0xff] }
  0x18   : > { %v213_v16 = vld [vmem:[%s933_s7] sm:$0xff]  ;;  %v214_v18 = vld [vmem:[%s933_s7 + $0x8] sm:$0xff]  ;;  %v215_v25 = vld [vmem:[%s933_s7 + $0x10] sm:$0xff]  ;;  %v691_v51 = vpack.c.bf16 %v358_v49, %v357_v48  ;;  %p757_p13 = pneg %p756_p12 }
  0x19   : > { %599 = vmatmul.mubr.msk.f32.vlgmr.msra.gmra.mrb[0].mxu0 %vm220_vm1, %v213_v16  ;;  %v216_v32 = vld [vmem:[%s933_s7 + $0x18] sm:$0xff]  ;;  %s819_s7 = smov [#allocation2]  }
  0x1a   : > { %308 = vmatprep.mubr.f32.mxu0 %v818_v3  ;;  %666 = vmatpush3.bf16.msra.mxu0 %v665_v10  ;;  %v342_v53 = vld [vmem:[%s1076_s2 + $0x78] sm:$0xff]  ;;  %s758_s8 = sshll.u32 %s819_s7, 4  ;;  %s759_s8 = int_to_ptr.vmem [resolvable:$false] %s758_s8 }
  0x1b   : > { %668 = vmatprep.subr.bf16.mxu0 %v667_v11  ;;  %705 = vmatpush3.bf16.msra.mxu1 %v673_v24  ;;  %v693_v54 = vpack.c.bf16 %v342_v53, %v341_v52  ;;  %s760_s9 = scalar_lea.vmem %s759_s8, 1024  ;;  %p761_p0 = scmp.lt.s32.totalorder %s1018_s20, %s759_s8 }
  0x1c   : > { %698 = vmatprep.subr.bf16.mxu1 %v675_v26  ;;  %p762_p1 = scmp.lt.s32.totalorder %s760_s9, %s754_s6 }
  0x1d   : > { %600 = vmatmul.mubr.msk.f32.gmra.mrb[2].mxu0 %vm220_vm1, %v214_v18 }
  0x1e   : > { %314 = vmatprep.mubr.f32.mxu0 %v818_v3  ;;  %670 = vmatpush3.bf16.msra.mxu0 %v669_v17  ;;  %p763_p2 = por %p762_p1, %p761_p0 }
  0x1f   : > { %672 = vmatprep.subr.bf16.mxu0 %v671_v19  ;;  %706 = vmatpush3.bf16.msra.mxu1 %v677_v31 }
  0x20   : > { %699 = vmatprep.subr.bf16.mxu1 %v679_v33  ;;  %p764_p3 = pnand %p763_p2, %p757_p13 }
  0x21   : > { %601 = vmatmul.mubr.msk.f32.gmra.mrb[4].mxu0 %vm220_vm1, %v215_v25 }
  0x22   : > { %320 = vmatprep.mubr.f32.mxu0 %v818_v3  ;;  %674 = vmatpush3.bf16.msra.mxu0 %v673_v24 }
  0x23   : > { %676 = vmatprep.subr.bf16.mxu0 %v675_v26  ;;  %707 = vmatpush3.bf16.msra.mxu1 %v681_v38 }
  0x24   : > { %700 = vmatprep.subr.bf16.mxu1 %v683_v39 }
  0x25   : > { %602 = vmatmul.mubr.msk.f32.gmra.mrb[6].mxu0 %vm220_vm1, %v216_v32 }
  0x26   : > { %678 = vmatpush3.bf16.msra.mxu0 %v677_v31 }
  0x27   : > { %680 = vmatprep.subr.bf16.mxu0 %v679_v33  ;;  %708 = vmatpush3.bf16.msra.mxu1 %v685_v44 }
  0x28   : > { %701 = vmatprep.subr.bf16.mxu1 %v687_v45 }
  0x2a   : > { %682 = vmatpush3.bf16.msra.mxu0 %v681_v38 }
  0x2b   : > { %684 = vmatprep.subr.bf16.mxu0 %v683_v39  ;;  %709 = vmatpush3.bf16.msra.mxu1 %v689_v50 }
  0x2c   : > { %702 = vmatprep.subr.bf16.mxu1 %v691_v51 }
  0x2e   : > { %686 = vmatpush3.bf16.msra.mxu0 %v685_v44 }
  0x2f   : > { %688 = vmatprep.subr.bf16.mxu0 %v687_v45  ;;  %710 = vmatpush3.bf16.msra.mxu1 %v693_v54 }
  0x32   : > { %690 = vmatpush3.bf16.msra.mxu0 %v689_v50 }
  0x33   : > { %692 = vmatprep.subr.bf16.mxu0 %v691_v51 }
  0x36   : > { %694 = vmatpush3.bf16.msra.mxu0 %v693_v54 }
  0xec   : > { %v304_v55 = vpop.f32.mrb[0].mxu0 }
  0xed   : > { %v306_v56 = vpop.f32.mrb[1].mxu0 }
  0xee   : > { %v613_v57 = vpack.c.bf16 %v306_v56, %v304_v55  ;;  %423 = vmatprep.mubr.f32.mxu0 %v306_v56 }
  0xef   : > { %424 = vmatmul.mubr.f32.vlgmr.msra.gmra.mrb[8].mxu0 %v304_v55 }
  0xf0   : > { %473 = vst [vmem:[%s192_s14] sm:$0xff] %v613_v57  ;;  %v310_v58 = vpop.f32.mrb[2].mxu0 }
  0xf1   : > { %v312_v59 = vpop.f32.mrb[3].mxu0 }
  0xf2   : > { %v614_v60 = vpack.c.bf16 %v312_v59, %v310_v58  ;;  %428 = vmatprep.mubr.f32.mxu1 %v312_v59 }
  0xf3   : > { %429 = vmatmul.mubr.f32.vlgmr.msra.gmra.mrb[0].mxu1 %v310_v58 }
  0xf4   : > { %474 = vst [vmem:[%s192_s14 + $0x8] sm:$0xff] %v614_v60  ;;  %v316_v61 = vpop.f32.mrb[4].mxu0 }
  0xf5   : > { %v318_v62 = vpop.f32.mrb[5].mxu0 }
  0xf6   : > { %v615_v63 = vpack.c.bf16 %v318_v62, %v316_v61  ;;  %433 = vmatprep.mubr.f32.mxu1 %v318_v62 }
  0xf7   : > { %434 = vmatmul.mubr.f32.gmra.mrb[2].mxu1 %v316_v61 }
  0xf8   : > { %475 = vst [vmem:[%s192_s14 + $0x10] sm:$0xff] %v615_v63  ;;  %v322_v0 = vpop.f32.mrb[6].mxu0 }
  0xf9   : > { %v324_v1 = vpop.f32.mrb[7].mxu0 }
  0xfa   : > { %v616_v2 = vpack.c.bf16 %v324_v1, %v322_v0  ;;  %438 = vmatprep.mubr.f32.mxu1 %v324_v1 }
  0xfb   : > { %439 = vmatmul.mubr.f32.gmra.mrb[4].mxu1 %v322_v0 }
  0xfc   : > { %476 = vst [vmem:[%s192_s14 + $0x18] sm:$0xff] %v616_v2 }
  0xfd   : > { %767 = shalt.err (!%p764_p3)
}
  0xfe   : > { %s768_s19 = scalar_lea.hbm %s1024_s30, 512  ;;  %s772_s12 = scalar_lea.hbm %s1077_s3, 1024 }
  0xff   : > { %p769_p4 = scmp.ne.s32.totalorder %s1024_s30, %s768_s19  ;;  %p773_p9 = scmp.lt.u32.totalorder %s1024_s30, %s1077_s3 }
 0x100   : > { %p774_p10 = scmp.lt.u32.totalorder %s772_s12, %s768_s19  ;;  %p776_p12 = scmp.lt.u32.totalorder %s768_s19, %s1024_s30 }
 0x101   : > { %p770_p7 = pnand %p769_p4, %p885_p5 }
 0x102   : > { %p775_p11 = por %p774_p10, %p773_p9 }
 0x103   : > { %p771_p8 = pneg %p770_p7 }
 0x104   : > { %p777_p13 = por %p776_p12, %p775_p11 }
 0x106   : > { %p778_p0 = pnand %p777_p13, %p771_p8 }
 0x108   : > { %781 = shalt.err (!%p778_p0)
}
 0x109   : > { %s820_s23 = smov 128   ;;  %s821_s27 = smov 8   ;;  %vm444_vm2 = vcmask 15360  }
 0x10a   : > { %711 = dma.vmem_to_hbm [thread:$0]  (%p885_p5), %s1018_s20, 512, %s1024_s30, %s1028_s5, %s820_s23, %s820_s23, %s821_s27  }
 0x10b   : > { %s211_s7 = scalar_lea.vmem %s1078_s4, %s594_s22 }
 0x1c2   : > { %v651_v3 = vpop.f32.mrb[8].mxu0 }
 0x1c3   : > { %v652_v4 = vpop.f32.mrb[9].mxu0 }
 0x1c4   : > { %v653_v5 = vadd.f32 %v652_v4, %v651_v3 }
 0x1c6   : > { %445 = vst.msk [vmem:[%s211_s7] sm:$0xff] %vm444_vm2, %v653_v5  ;;  %v654_v6 = vpop.f32.mrb[0].mxu1 }
 0x1c7   : > { %v655_v7 = vpop.f32.mrb[1].mxu1 }
 0x1c8   : > { %v656_v8 = vadd.f32 %v655_v7, %v654_v6 }
 0x1ca   : > { %446 = vst.msk [vmem:[%s211_s7 + $0x8] sm:$0xff] %vm444_vm2, %v656_v8  ;;  %v657_v9 = vpop.f32.mrb[2].mxu1 }
 0x1cb   : > { %v658_v10 = vpop.f32.mrb[3].mxu1 }
 0x1cc   : > { %v659_v11 = vadd.f32 %v658_v10, %v657_v9 }
 0x1ce   : > { %447 = vst.msk [vmem:[%s211_s7 + $0x10] sm:$0xff] %vm444_vm2, %v659_v11  ;;  %v660_v12 = vpop.f32.mrb[4].mxu1 }
 0x1cf   : > { %v661_v13 = vpop.f32.mrb[5].mxu1 }
 0x1d0   : > { %v662_v14 = vadd.f32 %v661_v13, %v660_v12 }
 0x1d2   : > { %448 = vst.msk [vmem:[%s211_s7 + $0x18] sm:$0xff] %vm444_vm2, %v662_v14 }
 0x1d3 PF: > { %p717_p5 = scmp.ge.s32.totalorder %s816_s18, 2  ;;  %s516_s25 = sand.u32 1, %s804_s15  }
 0x1d4   : > { %s517_s29 = scalar_lea.sflag [#allocation3], %s516_s25 }
 0x1d5   : > { %p714_p1 = pnand %p717_p5, %p889_p6 }
 0x1d7   : > { %799 = dma.done.wait (!%p714_p1), %s517_s29, 512  }
 0x1d8   : > { %801 = vsyncadd (!%p714_p1), %s517_s29, 4294966784  ;;  %p15_p2 = scmp.ge.s32.totalorder %s872_s21, 4   ;;  %s1081_s15 = smov %s808_s16 }
 0x1d9   : > { %s1082_s16 = smov %s812_s17  ;;  %s1083_s17 = smov %s883_s24 }
 0x1da   : > { %s1084_s18 = smov %s872_s21  ;;  %17 = sbr.rel (!%p15_p2) target bundleno = 3 (0x3), region = 79 }
 0x1e1   :  { %530 = vsyncpa [#allocation3], 1 }
 0x1e2   :  { %532 = vsyncpa [#allocation3 + $0x1], 1 }

</bundles_post_ra>
